<compile_context>
chip_gen: v5e
topology: v5e:2x2
jax: 0.10.0
libtpu: 0.0.40
codegen_flags: <defaults>
</compile_context>

<pallas_src>
import functools

import jax
import jax.numpy as jnp
from jax.experimental import pallas as pl
from jax.experimental.pallas import tpu as pltpu


def _tcn_kernel(x_ref, w_in_ref, b_in_ref, wdf_ref, bd_ref, w1_ref, b1_ref,
                w_out_ref, b_out_ref, feat_ref, out_ref, *,
                num_layers, seq_len):
    cdt = w_in_ref.dtype                                    # MXU compute dtype
    x = x_ref[...]                                          # (D, TP) packed lanes
    TP = x.shape[1]

    # conv_1x1 (dim -> F): lane-dense matmul, f32 accumulation.
    h = (jnp.dot(w_in_ref[...], x.astype(cdt),
                 preferred_element_type=jnp.float32) + b_in_ref[...])

    # Per-lane position inside its own T-segment (hoisted out of the layer loop;
    # JAX does not CSE broadcast_iota, so build it exactly once).
    t_in_seg = jax.lax.broadcasted_iota(jnp.int32, (1, TP), 1) % seq_len

    for i in range(num_layers):                             # DilatedResidualCausalLayer
        d = 2 ** i
        hc = h.astype(cdt)

        def shifted(s, hc=hc):
            # xs[:, t] = h[:, t - s] within each T-segment, 0 for t < s (causal pad).
            if s == 0:
                return hc
            r = pltpu.roll(hc, s, axis=1)                   # XLU lane rotation
            return jnp.where(t_in_seg < s, 0.0, r)          # also kills cross-batch leakage

        # Fused 3-tap causal dilated conv: stack shifts (2d, d, 0) along the
        # contraction axis and hit the MXU once with K = 3C.
        xs = jnp.concatenate([shifted(2 * d), shifted(d), hc], axis=0)   # (3C, TP)
        y = (jnp.dot(wdf_ref[i], xs, preferred_element_type=jnp.float32)
             + bd_ref[i])
        y = jnp.maximum(y, 0.0)                             # ReLU
        y = (jnp.dot(w1_ref[i], y.astype(cdt),
                     preferred_element_type=jnp.float32) + b1_ref[i])    # conv_1x1
        # TODO(synk): nn.Dropout inside the layer is identity at inference.
        h = h + y                                           # residual

    feat_ref[...] = h.astype(feat_ref.dtype)
    out_ref[...] = (jnp.dot(w_out_ref[...], h.astype(cdt),
                            preferred_element_type=jnp.float32)
                    + b_out_ref[...]).astype(out_ref.dtype)              # conv_out


def _pick_batch_group(N, T, lane_budget):
    """Largest batch group Nb (divisor of N) with lane-legal, VMEM-friendly Nb*T."""
    divs = [d for d in range(1, N + 1) if N % d == 0]
    legal = [d for d in divs if d == N or (d * T) % 128 == 0]
    fit = [d for d in legal if d * T <= lane_budget]
    return max(fit) if fit else min(legal)


def causal_tcn_forward(x, params, *, mask=None, compute_dtype=jnp.bfloat16,
                       lane_budget=4096):
    """BaseCausalTCN.forward (eval mode). Returns (features, logits) as (N,F,T)/(N,NC,T)."""
    N, D, T = x.shape
    if mask is not None:
        x = x * mask
    # TODO(synk): channel_dropout (nn.Dropout2d) is identity at inference.

    w_in = params["w_in"].astype(compute_dtype)
    b_in = params["b_in"].astype(jnp.float32)
    wd = params["wd"]                                        # (L, 3, F, F)
    L, _, Fm, _ = wd.shape
    # Fuse the 3 taps: (L, 3, Fout, Fin) -> (L, Fout, 3*Fin), tap-major contraction
    # ordered to match the in-kernel concat [shift 2d, shift d, shift 0].
    wdf = jnp.transpose(wd, (0, 2, 1, 3)).reshape(L, Fm, 3 * Fm).astype(compute_dtype)
    bd = params["bd"].astype(jnp.float32)
    w1 = params["w1"].astype(compute_dtype)
    b1 = params["b1"].astype(jnp.float32)
    w_out = params["w_out"].astype(compute_dtype)
    b_out = params["b_out"].astype(jnp.float32)
    NC = w_out.shape[0]

    # Pack batch along lanes: (N, D, T) -> (D, N*T); lane-dense matmuls and stores.
    xp = jnp.transpose(x, (1, 0, 2)).reshape(D, N * T)

    Nb = _pick_batch_group(N, T, lane_budget)
    TP = Nb * T
    grid = (N // Nb,)

    kernel = functools.partial(_tcn_kernel, num_layers=L, seq_len=T)

    def const_spec(a):
        nz = (0,) * a.ndim
        return pl.BlockSpec(a.shape, lambda b, nz=nz: nz)

    in_specs = [
        pl.BlockSpec((D, TP), lambda b: (0, b)),
        const_spec(w_in), const_spec(b_in),
        const_spec(wdf), const_spec(bd),
        const_spec(w1), const_spec(b1),
        const_spec(w_out), const_spec(b_out),
    ]
    out_specs = [
        pl.BlockSpec((Fm, TP), lambda b: (0, b)),
        pl.BlockSpec((NC, TP), lambda b: (0, b)),
    ]
    out_shape = (
        jax.ShapeDtypeStruct((Fm, N * T), jnp.float32),
        jax.ShapeDtypeStruct((NC, N * T), jnp.float32),
    )

    # Advisory cost estimate so XLA schedules the custom call sensibly.
    TT = N * T
    flops = (2 * Fm * D * TT
             + L * (2 * Fm * (3 * Fm) * TT + 2 * Fm * Fm * TT)
             + 2 * NC * Fm * TT)
    wbytes = sum(int(a.size) * a.dtype.itemsize
                 for a in (w_in, b_in, wdf, bd, w1, b1, w_out, b_out))
    bytes_accessed = (int(xp.size) * xp.dtype.itemsize
                      + (Fm + NC) * TT * 4
                      + wbytes)                              # weights fetched once
    cost = pl.CostEstimate(flops=int(flops), transcendentals=0,
                           bytes_accessed=int(bytes_accessed))

    feat, logits = pl.pallas_call(
        kernel,
        grid=grid,
        in_specs=in_specs,
        out_specs=out_specs,
        out_shape=out_shape,
        compiler_params=pltpu.CompilerParams(
            dimension_semantics=("parallel",)),
        cost_estimate=cost,
    )(xp, w_in, b_in, wdf, bd, w1, b1, w_out, b_out)

    feat = feat.reshape(Fm, N, T).transpose(1, 0, 2)         # (N, F, T)
    logits = logits.reshape(NC, N, T).transpose(1, 0, 2)     # (N, num_classes, T)
    return feat, logits


def init_params(key, num_layers, num_f_maps, dim, num_classes):
    ks = jax.random.split(key, 8)
    s = 0.1
    return dict(
        w_in=jax.random.normal(ks[0], (num_f_maps, dim), jnp.float32) * s,
        b_in=jax.random.normal(ks[1], (num_f_maps, 1), jnp.float32) * s,
        # wd[i, k] == torch conv_dilated.weight[:, :, k] of layer i
        wd=jax.random.normal(ks[2], (num_layers, 3, num_f_maps, num_f_maps), jnp.float32) * s,
        bd=jax.random.normal(ks[3], (num_layers, num_f_maps, 1), jnp.float32) * s,
        w1=jax.random.normal(ks[4], (num_layers, num_f_maps, num_f_maps), jnp.float32) * s,
        b1=jax.random.normal(ks[5], (num_layers, num_f_maps, 1), jnp.float32) * s,
        w_out=jax.random.normal(ks[6], (num_classes, num_f_maps), jnp.float32) * s,
        b_out=jax.random.normal(ks[7], (num_classes, 1), jnp.float32) * s,
    )


def reference_forward(x, p, mask=None):
    """Pure-JAX (f32) reference mirroring BaseCausalTCN.forward in eval mode."""
    if mask is not None:
        x = x * mask
    h = jnp.einsum('fd,ndt->nft', p['w_in'], x) + p['b_in'][None]
    L = p['wd'].shape[0]
    for i in range(L):
        d = 2 ** i
        w = jnp.transpose(p['wd'][i], (1, 2, 0))             # (Cout, Cin, 3)
        hp = jnp.pad(h, ((0, 0), (0, 0), (2 * d, 0)))        # F.pad([2d, 0])
        y = jax.lax.conv_general_dilated(
            hp, w, (1,), 'VALID', rhs_dilation=(d,),
            dimension_numbers=('NCH', 'OIH', 'NCH'))
        y = jax.nn.relu(y + p['bd'][i][None])
        y = jnp.einsum('oc,nct->not', p['w1'][i], y) + p['b1'][i][None]
        h = h + y
    out = jnp.einsum('of,nft->not', p['w_out'], h) + p['b_out'][None]
    return h, out


if __name__ == "__main__":
    key = jax.random.PRNGKey(0)
    kx, kp = jax.random.split(key)

    # Small shapes consistent with the module: x is (batch, dim, seq_len).
    N, D, T = 2, 32, 64
    num_layers, num_f_maps, num_classes = 3, 32, 8

    x = jax.random.normal(kx, (N, D, T), jnp.float32)
    params = init_params(kp, num_layers, num_f_maps, D, num_classes)

    feat_ref, out_ref = reference_forward(x, params)

    # Exactness check: f32 compute path.
    feat32, out32 = causal_tcn_forward(x, params, compute_dtype=jnp.float32)
    jax.block_until_ready((feat32, out32))
    assert feat32.shape == feat_ref.shape and out32.shape == out_ref.shape
    assert jnp.allclose(feat32, feat_ref, atol=2e-4, rtol=2e-4)
    assert jnp.allclose(out32, out_ref, atol=2e-4, rtol=2e-4)

    # Production path: bf16 MXU operands, f32 accumulation (looser tolerance).
    feat_bf, out_bf = causal_tcn_forward(x, params)           # compute_dtype=bfloat16
    jax.block_until_ready((feat_bf, out_bf))
    assert jnp.allclose(feat_bf, feat_ref, atol=5e-2, rtol=5e-2)
    assert jnp.allclose(out_bf, out_ref, atol=5e-2, rtol=5e-2)

    print("KERNEL_OK")
</pallas_src>

<mosaic_0001>
module attributes {stable_mosaic.version = 11 : i64} {
  func.func @_tcn_kernel(%arg0: i32, %arg1: memref<32x128xf32, #tpu.memory_space<vmem>>, %arg2: memref<32x32xf32, #tpu.memory_space<vmem>>, %arg3: memref<32x1xf32, #tpu.memory_space<vmem>>, %arg4: memref<3x32x96xf32, #tpu.memory_space<vmem>>, %arg5: memref<3x32x1xf32, #tpu.memory_space<vmem>>, %arg6: memref<3x32x32xf32, #tpu.memory_space<vmem>>, %arg7: memref<3x32x1xf32, #tpu.memory_space<vmem>>, %arg8: memref<8x32xf32, #tpu.memory_space<vmem>>, %arg9: memref<8x1xf32, #tpu.memory_space<vmem>>, %arg10: memref<32x128xf32, #tpu.memory_space<vmem>>, %arg11: memref<8x128xf32, #tpu.memory_space<vmem>>) attributes {dimension_semantics = [#tpu.dimension_semantics<parallel>], iteration_bounds = array<i64: 1>, scalar_prefetch = 0 : i64, scratch_operands = 0 : i64, tpu.core_type = #tpu.core_type<tc>, window_params = [{transform_indices = @transform_0, window_bounds = array<i64: 32, 128>}, {pipeline_mode = #tpu.pipeline_mode<synchronous>, transform_indices = @transform_1, window_bounds = array<i64: 32, 32>}, {pipeline_mode = #tpu.pipeline_mode<synchronous>, transform_indices = @transform_2, window_bounds = array<i64: 32, 1>}, {pipeline_mode = #tpu.pipeline_mode<synchronous>, transform_indices = @transform_3, window_bounds = array<i64: 3, 32, 96>}, {pipeline_mode = #tpu.pipeline_mode<synchronous>, transform_indices = @transform_4, window_bounds = array<i64: 3, 32, 1>}, {pipeline_mode = #tpu.pipeline_mode<synchronous>, transform_indices = @transform_5, window_bounds = array<i64: 3, 32, 32>}, {pipeline_mode = #tpu.pipeline_mode<synchronous>, transform_indices = @transform_6, window_bounds = array<i64: 3, 32, 1>}, {pipeline_mode = #tpu.pipeline_mode<synchronous>, transform_indices = @transform_7, window_bounds = array<i64: 8, 32>}, {pipeline_mode = #tpu.pipeline_mode<synchronous>, transform_indices = @transform_8, window_bounds = array<i64: 8, 1>}, {transform_indices = @transform_9, window_bounds = array<i64: 32, 128>}, {transform_indices = @transform_10, window_bounds = array<i64: 8, 128>}]} {
    %c0 = arith.constant 0 : index
    %c0_0 = arith.constant 0 : index
    %0 = vector.load %arg1[%c0, %c0_0] : memref<32x128xf32, #tpu.memory_space<vmem>>, vector<32x128xf32>
    %c0_1 = arith.constant 0 : index
    %c0_2 = arith.constant 0 : index
    %1 = vector.load %arg2[%c0_1, %c0_2] : memref<32x32xf32, #tpu.memory_space<vmem>>, vector<32x32xf32>
    %cst = arith.constant dense<0.000000e+00> : vector<32x128xf32>
    %2 = tpu.matmul %1, %0, %cst {dimension_numbers = #tpu.dot_dimension_numbers<[1], [0], [0], [1], [0, 0, 1, 1], [], []>} : vector<32x32xf32>, vector<32x128xf32>, vector<32x128xf32> -> vector<32x128xf32>
    %c0_3 = arith.constant 0 : index
    %c0_4 = arith.constant 0 : index
    %3 = vector.load %arg3[%c0_3, %c0_4] : memref<32x1xf32, #tpu.memory_space<vmem>>, vector<32x1xf32>
    %4 = vector.broadcast %3 : vector<32x1xf32> to vector<32x128xf32>
    %5 = arith.addf %2, %4 : vector<32x128xf32>
    %6 = tpu.iota {dimensions = array<i32: 1>} : vector<1x128xi32>
    %c64_i32 = arith.constant 64 : i32
    %c0_i32 = arith.constant 0 : i32
    %7 = arith.cmpi eq, %c64_i32, %c0_i32 : i32
    %c1_i32 = arith.constant 1 : i32
    %8 = arith.select %7, %c1_i32, %c64_i32 : i32
    %9 = vector.broadcast %8 : i32 to vector<1x128xi32>
    %10 = arith.remsi %6, %9 : vector<1x128xi32>
    %c0_i32_5 = arith.constant 0 : i32
    %11 = vector.broadcast %c0_i32_5 : i32 to vector<1x128xi32>
    %12 = arith.cmpi ne, %10, %11 : vector<1x128xi32>
    %c0_i32_6 = arith.constant 0 : i32
    %13 = vector.broadcast %c0_i32_6 : i32 to vector<1x128xi32>
    %14 = arith.cmpi slt, %10, %13 : vector<1x128xi32>
    %c0_i32_7 = arith.constant 0 : i32
    %15 = arith.cmpi slt, %8, %c0_i32_7 : i32
    %16 = vector.broadcast %15 : i1 to vector<1x128xi1>
    %17 = vector.broadcast %16 : vector<1x128xi1> to vector<1x128xi1>
    %18 = arith.xori %14, %17 : vector<1x128xi1>
    %19 = arith.andi %18, %12 : vector<1x128xi1>
    %20 = vector.broadcast %8 : i32 to vector<1x128xi32>
    %21 = arith.addi %10, %20 : vector<1x128xi32>
    %22 = arith.select %19, %21, %10 : vector<1x128xi1>, vector<1x128xi32>
    %c2_i32 = arith.constant 2 : i32
    %23 = tpu.dynamic_rotate %5 by %c2_i32 dim 1 : vector<32x128xf32>, i32 -> vector<32x128xf32>
    %c2_i32_8 = arith.constant 2 : i32
    %24 = vector.broadcast %c2_i32_8 : i32 to vector<1x128xi32>
    %25 = arith.cmpi slt, %22, %24 : vector<1x128xi32>
    %cst_9 = arith.constant 0.000000e+00 : f32
    %26 = vector.shape_cast %25 : vector<1x128xi1> to vector<1x128xi1>
    %27 = vector.broadcast %26 : vector<1x128xi1> to vector<32x128xi1>
    %28 = vector.broadcast %cst_9 : f32 to vector<32x128xf32>
    %29 = arith.select %27, %28, %23 : vector<32x128xi1>, vector<32x128xf32>
    %c1_i32_10 = arith.constant 1 : i32
    %30 = tpu.dynamic_rotate %5 by %c1_i32_10 dim 1 : vector<32x128xf32>, i32 -> vector<32x128xf32>
    %c1_i32_11 = arith.constant 1 : i32
    %31 = vector.broadcast %c1_i32_11 : i32 to vector<1x128xi32>
    %32 = arith.cmpi slt, %22, %31 : vector<1x128xi32>
    %cst_12 = arith.constant 0.000000e+00 : f32
    %33 = vector.shape_cast %32 : vector<1x128xi1> to vector<1x128xi1>
    %34 = vector.broadcast %33 : vector<1x128xi1> to vector<32x128xi1>
    %35 = vector.broadcast %cst_12 : f32 to vector<32x128xf32>
    %36 = arith.select %34, %35, %30 : vector<32x128xi1>, vector<32x128xf32>
    %37 = tpu.concatenate %29, %36, %5 in 0 : vector<32x128xf32>, vector<32x128xf32>, vector<32x128xf32> -> vector<96x128xf32>
    %c0_13 = arith.constant 0 : index
    %c0_14 = arith.constant 0 : index
    %c0_15 = arith.constant 0 : index
    %38 = vector.load %arg4[%c0_13, %c0_14, %c0_15] : memref<3x32x96xf32, #tpu.memory_space<vmem>>, vector<1x32x96xf32>
    %39 = vector.shape_cast %38 : vector<1x32x96xf32> to vector<32x96xf32>
    %cst_16 = arith.constant dense<0.000000e+00> : vector<32x128xf32>
    %40 = tpu.matmul %39, %37, %cst_16 {dimension_numbers = #tpu.dot_dimension_numbers<[1], [0], [0], [1], [0, 0, 1, 1], [], []>} : vector<32x96xf32>, vector<96x128xf32>, vector<32x128xf32> -> vector<32x128xf32>
    %c0_17 = arith.constant 0 : index
    %c0_18 = arith.constant 0 : index
    %c0_19 = arith.constant 0 : index
    %41 = vector.load %arg5[%c0_17, %c0_18, %c0_19] : memref<3x32x1xf32, #tpu.memory_space<vmem>>, vector<1x32x1xf32>
    %42 = vector.shape_cast %41 : vector<1x32x1xf32> to vector<32x1xf32>
    %43 = vector.broadcast %42 : vector<32x1xf32> to vector<32x128xf32>
    %44 = arith.addf %40, %43 : vector<32x128xf32>
    %cst_20 = arith.constant 0.000000e+00 : f32
    %45 = vector.broadcast %cst_20 : f32 to vector<32x128xf32>
    %46 = arith.maximumf %44, %45 : vector<32x128xf32>
    %c0_21 = arith.constant 0 : index
    %c0_22 = arith.constant 0 : index
    %c0_23 = arith.constant 0 : index
    %47 = vector.load %arg6[%c0_21, %c0_22, %c0_23] : memref<3x32x32xf32, #tpu.memory_space<vmem>>, vector<1x32x32xf32>
    %48 = vector.shape_cast %47 : vector<1x32x32xf32> to vector<32x32xf32>
    %cst_24 = arith.constant dense<0.000000e+00> : vector<32x128xf32>
    %49 = tpu.matmul %48, %46, %cst_24 {dimension_numbers = #tpu.dot_dimension_numbers<[1], [0], [0], [1], [0, 0, 1, 1], [], []>} : vector<32x32xf32>, vector<32x128xf32>, vector<32x128xf32> -> vector<32x128xf32>
    %c0_25 = arith.constant 0 : index
    %c0_26 = arith.constant 0 : index
    %c0_27 = arith.constant 0 : index
    %50 = vector.load %arg7[%c0_25, %c0_26, %c0_27] : memref<3x32x1xf32, #tpu.memory_space<vmem>>, vector<1x32x1xf32>
    %51 = vector.shape_cast %50 : vector<1x32x1xf32> to vector<32x1xf32>
    %52 = vector.broadcast %51 : vector<32x1xf32> to vector<32x128xf32>
    %53 = arith.addf %49, %52 : vector<32x128xf32>
    %54 = arith.addf %5, %53 : vector<32x128xf32>
    %c4_i32 = arith.constant 4 : i32
    %55 = tpu.dynamic_rotate %54 by %c4_i32 dim 1 : vector<32x128xf32>, i32 -> vector<32x128xf32>
    %c4_i32_28 = arith.constant 4 : i32
    %56 = vector.broadcast %c4_i32_28 : i32 to vector<1x128xi32>
    %57 = arith.cmpi slt, %22, %56 : vector<1x128xi32>
    %cst_29 = arith.constant 0.000000e+00 : f32
    %58 = vector.shape_cast %57 : vector<1x128xi1> to vector<1x128xi1>
    %59 = vector.broadcast %58 : vector<1x128xi1> to vector<32x128xi1>
    %60 = vector.broadcast %cst_29 : f32 to vector<32x128xf32>
    %61 = arith.select %59, %60, %55 : vector<32x128xi1>, vector<32x128xf32>
    %c2_i32_30 = arith.constant 2 : i32
    %62 = tpu.dynamic_rotate %54 by %c2_i32_30 dim 1 : vector<32x128xf32>, i32 -> vector<32x128xf32>
    %c2_i32_31 = arith.constant 2 : i32
    %63 = vector.broadcast %c2_i32_31 : i32 to vector<1x128xi32>
    %64 = arith.cmpi slt, %22, %63 : vector<1x128xi32>
    %cst_32 = arith.constant 0.000000e+00 : f32
    %65 = vector.shape_cast %64 : vector<1x128xi1> to vector<1x128xi1>
    %66 = vector.broadcast %65 : vector<1x128xi1> to vector<32x128xi1>
    %67 = vector.broadcast %cst_32 : f32 to vector<32x128xf32>
    %68 = arith.select %66, %67, %62 : vector<32x128xi1>, vector<32x128xf32>
    %69 = tpu.concatenate %61, %68, %54 in 0 : vector<32x128xf32>, vector<32x128xf32>, vector<32x128xf32> -> vector<96x128xf32>
    %c1 = arith.constant 1 : index
    %c0_33 = arith.constant 0 : index
    %c0_34 = arith.constant 0 : index
    %70 = vector.load %arg4[%c1, %c0_33, %c0_34] : memref<3x32x96xf32, #tpu.memory_space<vmem>>, vector<1x32x96xf32>
    %71 = vector.shape_cast %70 : vector<1x32x96xf32> to vector<32x96xf32>
    %cst_35 = arith.constant dense<0.000000e+00> : vector<32x128xf32>
    %72 = tpu.matmul %71, %69, %cst_35 {dimension_numbers = #tpu.dot_dimension_numbers<[1], [0], [0], [1], [0, 0, 1, 1], [], []>} : vector<32x96xf32>, vector<96x128xf32>, vector<32x128xf32> -> vector<32x128xf32>
    %c1_36 = arith.constant 1 : index
    %c0_37 = arith.constant 0 : index
    %c0_38 = arith.constant 0 : index
    %73 = vector.load %arg5[%c1_36, %c0_37, %c0_38] : memref<3x32x1xf32, #tpu.memory_space<vmem>>, vector<1x32x1xf32>
    %74 = vector.shape_cast %73 : vector<1x32x1xf32> to vector<32x1xf32>
    %75 = vector.broadcast %74 : vector<32x1xf32> to vector<32x128xf32>
    %76 = arith.addf %72, %75 : vector<32x128xf32>
    %cst_39 = arith.constant 0.000000e+00 : f32
    %77 = vector.broadcast %cst_39 : f32 to vector<32x128xf32>
    %78 = arith.maximumf %76, %77 : vector<32x128xf32>
    %c1_40 = arith.constant 1 : index
    %c0_41 = arith.constant 0 : index
    %c0_42 = arith.constant 0 : index
    %79 = vector.load %arg6[%c1_40, %c0_41, %c0_42] : memref<3x32x32xf32, #tpu.memory_space<vmem>>, vector<1x32x32xf32>
    %80 = vector.shape_cast %79 : vector<1x32x32xf32> to vector<32x32xf32>
    %cst_43 = arith.constant dense<0.000000e+00> : vector<32x128xf32>
    %81 = tpu.matmul %80, %78, %cst_43 {dimension_numbers = #tpu.dot_dimension_numbers<[1], [0], [0], [1], [0, 0, 1, 1], [], []>} : vector<32x32xf32>, vector<32x128xf32>, vector<32x128xf32> -> vector<32x128xf32>
    %c1_44 = arith.constant 1 : index
    %c0_45 = arith.constant 0 : index
    %c0_46 = arith.constant 0 : index
    %82 = vector.load %arg7[%c1_44, %c0_45, %c0_46] : memref<3x32x1xf32, #tpu.memory_space<vmem>>, vector<1x32x1xf32>
    %83 = vector.shape_cast %82 : vector<1x32x1xf32> to vector<32x1xf32>
    %84 = vector.broadcast %83 : vector<32x1xf32> to vector<32x128xf32>
    %85 = arith.addf %81, %84 : vector<32x128xf32>
    %86 = arith.addf %54, %85 : vector<32x128xf32>
    %c8_i32 = arith.constant 8 : i32
    %87 = tpu.dynamic_rotate %86 by %c8_i32 dim 1 : vector<32x128xf32>, i32 -> vector<32x128xf32>
    %c8_i32_47 = arith.constant 8 : i32
    %88 = vector.broadcast %c8_i32_47 : i32 to vector<1x128xi32>
    %89 = arith.cmpi slt, %22, %88 : vector<1x128xi32>
    %cst_48 = arith.constant 0.000000e+00 : f32
    %90 = vector.shape_cast %89 : vector<1x128xi1> to vector<1x128xi1>
    %91 = vector.broadcast %90 : vector<1x128xi1> to vector<32x128xi1>
    %92 = vector.broadcast %cst_48 : f32 to vector<32x128xf32>
    %93 = arith.select %91, %92, %87 : vector<32x128xi1>, vector<32x128xf32>
    %c4_i32_49 = arith.constant 4 : i32
    %94 = tpu.dynamic_rotate %86 by %c4_i32_49 dim 1 : vector<32x128xf32>, i32 -> vector<32x128xf32>
    %c4_i32_50 = arith.constant 4 : i32
    %95 = vector.broadcast %c4_i32_50 : i32 to vector<1x128xi32>
    %96 = arith.cmpi slt, %22, %95 : vector<1x128xi32>
    %cst_51 = arith.constant 0.000000e+00 : f32
    %97 = vector.shape_cast %96 : vector<1x128xi1> to vector<1x128xi1>
    %98 = vector.broadcast %97 : vector<1x128xi1> to vector<32x128xi1>
    %99 = vector.broadcast %cst_51 : f32 to vector<32x128xf32>
    %100 = arith.select %98, %99, %94 : vector<32x128xi1>, vector<32x128xf32>
    %101 = tpu.concatenate %93, %100, %86 in 0 : vector<32x128xf32>, vector<32x128xf32>, vector<32x128xf32> -> vector<96x128xf32>
    %c2 = arith.constant 2 : index
    %c0_52 = arith.constant 0 : index
    %c0_53 = arith.constant 0 : index
    %102 = vector.load %arg4[%c2, %c0_52, %c0_53] : memref<3x32x96xf32, #tpu.memory_space<vmem>>, vector<1x32x96xf32>
    %103 = vector.shape_cast %102 : vector<1x32x96xf32> to vector<32x96xf32>
    %cst_54 = arith.constant dense<0.000000e+00> : vector<32x128xf32>
    %104 = tpu.matmul %103, %101, %cst_54 {dimension_numbers = #tpu.dot_dimension_numbers<[1], [0], [0], [1], [0, 0, 1, 1], [], []>} : vector<32x96xf32>, vector<96x128xf32>, vector<32x128xf32> -> vector<32x128xf32>
    %c2_55 = arith.constant 2 : index
    %c0_56 = arith.constant 0 : index
    %c0_57 = arith.constant 0 : index
    %105 = vector.load %arg5[%c2_55, %c0_56, %c0_57] : memref<3x32x1xf32, #tpu.memory_space<vmem>>, vector<1x32x1xf32>
    %106 = vector.shape_cast %105 : vector<1x32x1xf32> to vector<32x1xf32>
    %107 = vector.broadcast %106 : vector<32x1xf32> to vector<32x128xf32>
    %108 = arith.addf %104, %107 : vector<32x128xf32>
    %cst_58 = arith.constant 0.000000e+00 : f32
    %109 = vector.broadcast %cst_58 : f32 to vector<32x128xf32>
    %110 = arith.maximumf %108, %109 : vector<32x128xf32>
    %c2_59 = arith.constant 2 : index
    %c0_60 = arith.constant 0 : index
    %c0_61 = arith.constant 0 : index
    %111 = vector.load %arg6[%c2_59, %c0_60, %c0_61] : memref<3x32x32xf32, #tpu.memory_space<vmem>>, vector<1x32x32xf32>
    %112 = vector.shape_cast %111 : vector<1x32x32xf32> to vector<32x32xf32>
    %cst_62 = arith.constant dense<0.000000e+00> : vector<32x128xf32>
    %113 = tpu.matmul %112, %110, %cst_62 {dimension_numbers = #tpu.dot_dimension_numbers<[1], [0], [0], [1], [0, 0, 1, 1], [], []>} : vector<32x32xf32>, vector<32x128xf32>, vector<32x128xf32> -> vector<32x128xf32>
    %c2_63 = arith.constant 2 : index
    %c0_64 = arith.constant 0 : index
    %c0_65 = arith.constant 0 : index
    %114 = vector.load %arg7[%c2_63, %c0_64, %c0_65] : memref<3x32x1xf32, #tpu.memory_space<vmem>>, vector<1x32x1xf32>
    %115 = vector.shape_cast %114 : vector<1x32x1xf32> to vector<32x1xf32>
    %116 = vector.broadcast %115 : vector<32x1xf32> to vector<32x128xf32>
    %117 = arith.addf %113, %116 : vector<32x128xf32>
    %118 = arith.addf %86, %117 : vector<32x128xf32>
    %c0_66 = arith.constant 0 : index
    %c0_67 = arith.constant 0 : index
    %119 = vector.load %arg10[%c0_66, %c0_67] : memref<32x128xf32, #tpu.memory_space<vmem>>, vector<32x128xf32>
    tpu.vector_store %arg10[%c0_66, %c0_67], %118 {strides = array<i32>} : memref<32x128xf32, #tpu.memory_space<vmem>>, vector<32x128xf32>,
    %c0_68 = arith.constant 0 : index
    %c0_69 = arith.constant 0 : index
    %120 = vector.load %arg8[%c0_68, %c0_69] : memref<8x32xf32, #tpu.memory_space<vmem>>, vector<8x32xf32>
    %cst_70 = arith.constant dense<0.000000e+00> : vector<8x128xf32>
    %121 = tpu.matmul %120, %118, %cst_70 {dimension_numbers = #tpu.dot_dimension_numbers<[1], [0], [0], [1], [0, 0, 1, 1], [], []>} : vector<8x32xf32>, vector<32x128xf32>, vector<8x128xf32> -> vector<8x128xf32>
    %c0_71 = arith.constant 0 : index
    %c0_72 = arith.constant 0 : index
    %122 = vector.load %arg9[%c0_71, %c0_72] : memref<8x1xf32, #tpu.memory_space<vmem>>, vector<8x1xf32>
    %123 = vector.broadcast %122 : vector<8x1xf32> to vector<8x128xf32>
    %124 = arith.addf %121, %123 : vector<8x128xf32>
    %c0_73 = arith.constant 0 : index
    %c0_74 = arith.constant 0 : index
    %125 = vector.load %arg11[%c0_73, %c0_74] : memref<8x128xf32, #tpu.memory_space<vmem>>, vector<8x128xf32>
    tpu.vector_store %arg11[%c0_73, %c0_74], %124 {strides = array<i32>} : memref<8x128xf32, #tpu.memory_space<vmem>>, vector<8x128xf32>,
    return
  }
  func.func @transform_0(%arg0: i32) -> (i32, i32) {
    %c0_i32 = arith.constant 0 : i32
    %c0_i32_0 = arith.constant 0 : i32
    return %c0_i32, %arg0 : i32, i32
  }
  func.func @transform_1(%arg0: i32) -> (i32, i32) {
    %c0_i32 = arith.constant 0 : i32
    %c0_i32_0 = arith.constant 0 : i32
    %c0_i32_1 = arith.constant 0 : i32
    return %c0_i32, %c0_i32_0 : i32, i32
  }
  func.func @transform_2(%arg0: i32) -> (i32, i32) {
    %c0_i32 = arith.constant 0 : i32
    %c0_i32_0 = arith.constant 0 : i32
    %c0_i32_1 = arith.constant 0 : i32
    return %c0_i32, %c0_i32_0 : i32, i32
  }
  func.func @transform_3(%arg0: i32) -> (i32, i32, i32) {
    %c0_i32 = arith.constant 0 : i32
    %c0_i32_0 = arith.constant 0 : i32
    %c0_i32_1 = arith.constant 0 : i32
    %c0_i32_2 = arith.constant 0 : i32
    return %c0_i32, %c0_i32_0, %c0_i32_1 : i32, i32, i32
  }
  func.func @transform_4(%arg0: i32) -> (i32, i32, i32) {
    %c0_i32 = arith.constant 0 : i32
    %c0_i32_0 = arith.constant 0 : i32
    %c0_i32_1 = arith.constant 0 : i32
    %c0_i32_2 = arith.constant 0 : i32
    return %c0_i32, %c0_i32_0, %c0_i32_1 : i32, i32, i32
  }
  func.func @transform_5(%arg0: i32) -> (i32, i32, i32) {
    %c0_i32 = arith.constant 0 : i32
    %c0_i32_0 = arith.constant 0 : i32
    %c0_i32_1 = arith.constant 0 : i32
    %c0_i32_2 = arith.constant 0 : i32
    return %c0_i32, %c0_i32_0, %c0_i32_1 : i32, i32, i32
  }
  func.func @transform_6(%arg0: i32) -> (i32, i32, i32) {
    %c0_i32 = arith.constant 0 : i32
    %c0_i32_0 = arith.constant 0 : i32
    %c0_i32_1 = arith.constant 0 : i32
    %c0_i32_2 = arith.constant 0 : i32
    return %c0_i32, %c0_i32_0, %c0_i32_1 : i32, i32, i32
  }
  func.func @transform_7(%arg0: i32) -> (i32, i32) {
    %c0_i32 = arith.constant 0 : i32
    %c0_i32_0 = arith.constant 0 : i32
    %c0_i32_1 = arith.constant 0 : i32
    return %c0_i32, %c0_i32_0 : i32, i32
  }
  func.func @transform_8(%arg0: i32) -> (i32, i32) {
    %c0_i32 = arith.constant 0 : i32
    %c0_i32_0 = arith.constant 0 : i32
    %c0_i32_1 = arith.constant 0 : i32
    return %c0_i32, %c0_i32_0 : i32, i32
  }
  func.func @transform_9(%arg0: i32) -> (i32, i32) {
    %c0_i32 = arith.constant 0 : i32
    %c0_i32_0 = arith.constant 0 : i32
    return %c0_i32, %arg0 : i32, i32
  }
  func.func @transform_10(%arg0: i32) -> (i32, i32) {
    %c0_i32 = arith.constant 0 : i32
    %c0_i32_0 = arith.constant 0 : i32
    return %c0_i32, %arg0 : i32, i32
  }
}

</mosaic_0001>

<bundles_post_ra>
// kernel: tpu_custom_call.1
= control target key start
LH: loop header
LB: loop body
LE: loop exit
PB: predicated region body
PF: predicated region fallthrough
CT: control target
= control target key end

     0   :  { %16 = vsyncpa [#allocation3], 0  ;;  %s1360_s0 = inlined_call_operand.vmem [shape: f32[32,128], index: 0, kind: input, shape index: {}]   ;;  %s1361_s1 = inlined_call_operand.hbm [shape: f32[32,32], index: 1, kind: input, shape index: {}]   ;;  %s1362_s2 = inlined_call_operand.vmem [shape: f32[32,1], index: 2, kind: input, shape index: {}]   ;;  %s1363_s3 = inlined_call_operand.vmem [shape: f32[3,32,96], index: 3, kind: input, shape index: {}]   ;;  %s1364_s4 = inlined_call_operand.vmem [shape: f32[3,32,1], index: 4, kind: input, shape index: {}]   ;;  %s1365_s5 = inlined_call_operand.vmem [shape: f32[3,32,32], index: 5, kind: input, shape index: {}]   ;;  %s1366_s6 = inlined_call_operand.vmem [shape: f32[3,32,1], index: 6, kind: input, shape index: {}]   ;;  %s1367_s7 = inlined_call_operand.vmem [shape: f32[8,32], index: 7, kind: input, shape index: {}]   ;;  %s1368_s8 = inlined_call_operand.vmem [shape: f32[8,1], index: 8, kind: input, shape index: {}]   ;;  %s1369_s9 = inlined_call_operand.hbm [shape: f32[32,128], index: 9, kind: output, shape index: {0}]   ;;  %s1370_s10 = inlined_call_operand.hbm [shape: f32[8,128], index: 10, kind: output, shape index: {1}]  }
   0x1   :  { %17 = vsyncpa [#allocation4], 0 }
   0x2   :  { %18 = vsyncpa [#allocation7], 0  ;;  %s25_s15 = sshll.u32 %s1361_s1, 4  ;;  %s948_s16 = smov [#allocation2]   ;;  %s26_s15 = int_to_ptr.hbm [resolvable:$true] %s25_s15 }
   0x3   :  { %s27_s17 = sshll.u32 %s948_s16, 4  ;;  %s949_s18 = smov 128   ;;  %s28_s17 = int_to_ptr.vmem [resolvable:$true] %s27_s17 }
   0x4   :  { %s950_s19 = smov 8  }
   0x5   :  { %33 = dma.hbm_to_vmem [thread:$0]  %s26_s15, 512, %s28_s17, [#allocation3], %s949_s18, %s949_s18, %s950_s19  }
   0x6   :  { %942 = dma.done.wait [#allocation3], 512  }
   0x7   :  { %943 = vsyncadd [#allocation3], 4294966784  ;;  %v951_v0 = vmov 0   ;;  %v55_v1 = vld [vmem:[%s1360_s0 + $0x18] sm:$0xff]  ;;  %v54_v2 = vld [vmem:[%s1360_s0 + $0x10] sm:$0xff]  ;;  %vm84_vm0 = vcmask 261120   ;;  %v126_v31 = vlaneseq }
   0x8   :  { %868 = vset.pattern.permute.xlu1 %v951_v0  ;;  %867 = vset.pattern.permute.xlu0 %v951_v0  ;;  %v61_v3 = vld [vmem:[%s1362_s2 + $0x8] sm:$0xff]  ;;  %v63_v5 = vld [vmem:[%s1362_s2 + $0x18] sm:$0xff]  ;;  %v52_v6 = vld [vmem:[%s1360_s0] sm:$0xff]  ;;  %vm198_vm3 = vcmask 785408   ;;  %s954_s28 = smov 4   ;;  %s712_s14 = sshll.u32 %s1369_s9, 4  ;;  %s713_s14 = int_to_ptr.hbm [resolvable:$true] %s712_s14 }
   0x9   :  { %869 = vset.pattern.permute.xlu2 %v951_v0  ;;  %109 = vmatpush.msra.mxu0 %v55_v1  ;;  %v53_v4 = vld [vmem:[%s1360_s0 + $0x8] sm:$0xff]  ;;  %v56_v7 = vld [vmem:[#allocation2] sm:$0xff]  ;;  %v62_v9 = vld [vmem:[%s1362_s2 + $0x10] sm:$0xff]  ;;  %s952_s0 = smov 1   ;;  %v127_v32 = vand.u32 127, %v126_v31 }
   0xa   :  { %71 = vperm.xlu1 %868, %v61_v3   ;;  %81 = vperm.xlu0 %867, %v63_v5   ;;  %v60_v8 = vld [vmem:[%s1362_s2] sm:$0xff]  ;;  %v57_v10 = vld [vmem:[#allocation2 + $0x8] sm:$0xff]  ;;  %v58_v11 = vld [vmem:[#allocation2 + $0x10] sm:$0xff]  ;;  %s953_s2 = smov 2  }
   0xb   :  { %110 = vmatpush.msra.mxu0 %v54_v2  ;;  %v59_v12 = vld [vmem:[#allocation2 + $0x18] sm:$0xff]  ;;  %v176_v23 = vld [vmem:[%s1364_s4 + $0x10] sm:$0xff]  ;;  %v174_v28 = vld [vmem:[%s1364_s4] sm:$0xff]  ;;  %v1088_v34 = vand.u32 63, %v127_v32 }
   0xc   :  { %v177_v26 = vld [vmem:[%s1364_s4 + $0x18] sm:$0xff]  ;;  %v248_v29 = vld [vmem:[%s1366_s6] sm:$0xff]  ;;  %v249_v30 = vld [vmem:[%s1366_s6 + $0x8] sm:$0xff] }
   0xd   :  { %111 = vmatpush.msra.mxu0 %v53_v4  ;;  %v251_v27 = vld [vmem:[%s1366_s6 + $0x18] sm:$0xff]  ;;  %vm850_vm1 = vcmp.ge.s32.totalorder %v1088_v34, 1  ;;  %vm851_vm2 = vcmp.ge.s32.totalorder %v1088_v34, 2  ;;  %v175_v39 = vld [vmem:[%s1364_s4 + $0x8] sm:$0xff]  ;;  %v170_v42 = vld [vmem:[%s1363_s3] sm:$0xff]  ;;  %vm852_vm4 = vcmp.ge.s32.totalorder %v1088_v34, 4 }
   0xe   :  { %v250_v44 = vld [vmem:[%s1366_s6 + $0x10] sm:$0xff]  ;;  %v171_v45 = vld [vmem:[%s1363_s3 + $0x8] sm:$0xff]  ;;  %v173_v47 = vld [vmem:[%s1363_s3 + $0x18] sm:$0xff]  ;;  %vm853_vm5 = vcmp.ge.s32.totalorder %v1088_v34, 8 }
   0xf   :  { %112 = vmatpush.msra.mxu0 %v52_v6  ;;  %v172_v46 = vld [vmem:[%s1363_s3 + $0x10] sm:$0xff]  ;;  %v244_v0 = vld [vmem:[%s1365_s5] sm:$0xff]  ;;  %v245_v1 = vld [vmem:[%s1365_s5 + $0x8] sm:$0xff] }
  0x10   :  { %741 = vmatmul.msk.f32.vlgmr.msra.gmra.mxu0 %vm84_vm0, %v56_v7  ;;  %v246_v2 = vld [vmem:[%s1365_s5 + $0x10] sm:$0xff]  ;;  %v247_v3 = vld [vmem:[%s1365_s5 + $0x18] sm:$0xff] }
  0x11   :  { %v811_v34 = vld [vmem:[%s1363_s3 + $0x50] sm:$0xff] }
  0x12   :  { %66 = vperm.xlu1 %868, %v60_v8   ;;  %76 = vperm.xlu0 %867, %v62_v9  }
  0x18   :  { %742 = vmatmul.msk.f32.gmra.mxu0 %vm84_vm0, %v57_v10 }
  0x20   :  { %743 = vmatmul.msk.f32.gmra.mxu0 %vm84_vm0, %v58_v11 }
  0x28   :  { %744 = vmatmul.msk.f32.gmra.mxu0 %vm84_vm0, %v59_v12 }
  0x7c   :  { %v72_v13 = vpop.permute.xlu1 %71  ;;  %v82_v17 = vpop.permute.xlu0 %81 }
  0x84   :  { %v67_v14 = vpop.permute.xlu1 %66  ;;  %v77_v20 = vpop.permute.xlu0 %76 }
  0x8d   :  { %v114_v15 = vpop.f32.mrf.mxu0 }
  0x8e   :  { %v1046_v16 = vadd.f32 %v114_v15, %v67_v14 }
  0x90   :  { %155 = vrot.lane.b32.xlu1 %v1046_v16, %s952_s0 }
  0x95   :  { %v117_v18 = vpop.f32.mrf.mxu0 }
  0x96   :  { %v1049_v19 = vadd.f32 %v117_v18, %v72_v13  ;;  %v776_v18 = vld [vmem:[%s1364_s4 + $0x38] sm:$0xff] }
  0x98   :  { %157 = vrot.lane.b32.xlu0 %v1049_v19, %s952_s0  ;;  %142 = vrot.lane.b32.xlu1 %v1049_v19, %s953_s2 }
  0x9d   :  { %v120_v21 = vpop.f32.mrf.mxu0 }
  0x9e   :  { %v1054_v22 = vadd.f32 %v120_v21, %v77_v20 }
  0xa0   :  { %159 = vrot.lane.b32.xlu2 %v1054_v22, %s952_s0  ;;  %144 = vrot.lane.b32.xlu0 %v1054_v22, %s953_s2 }
  0xa1   :  { %190 = vperm.xlu1 %868, %v176_v23   ;;  %v774_v23 = vld [vmem:[%s1364_s4 + $0x28] sm:$0xff] }
  0xa5   :  { %v123_v24 = vpop.f32.mrf.mxu0 }
  0xa6   :  { %v1062_v25 = vadd.f32 %v123_v24, %v82_v17  ;;  %v775_v24 = vld [vmem:[%s1364_s4 + $0x30] sm:$0xff] }
  0xa8   :  { %215 = vmatpush.msra.mxu1 %v1062_v25  ;;  %161 = vrot.lane.b32.xlu2 %v1062_v25, %s952_s0  ;;  %s956_s0 = smov [#allocation6]  }
  0xa9   :  { %195 = vperm.xlu0 %867, %v177_v26   ;;  %269 = vperm.xlu1 %868, %v251_v27   ;;  %v804_v26 = vld [vmem:[%s1366_s6 + $0x38] sm:$0xff]  ;;  %v801_v27 = vld [vmem:[%s1366_s6 + $0x20] sm:$0xff]  ;;  %s724_s15 = sshll.u32 %s956_s0, 4  ;;  %s725_s15 = int_to_ptr.vmem [resolvable:$true] %s724_s15 }
  0xaa   :  { %216 = vmatpush.msra.mxu1 %v1054_v22 }
  0xac   :  { %217 = vmatpush.msra.mxu1 %v1049_v19 }
  0xae   :  { %218 = vmatpush.msra.mxu1 %v1046_v16 }
  0xb0   :  { %146 = vrot.lane.b32.xlu2 %v1062_v25, %s953_s2 }
  0xb1   :  { %180 = vperm.xlu0 %867, %v174_v28   ;;  %254 = vperm.xlu1 %868, %v248_v29  }
  0xb8   :  { %140 = vrot.lane.b32.xlu2 %v1046_v16, %s953_s2 }
  0xb9   :  { %259 = vperm.xlu0 %867, %v249_v30  }
  0xc0   :  { %185 = vperm.xlu2 %869, %v175_v39   ;;  %v771_v39 = vld [vmem:[%s1363_s3 + $0x30] sm:$0xff] }
  0xc8   :  { %264 = vperm.xlu2 %869, %v250_v44  }
  0xfa   :  { %v160_v33 = vpop.permute.xlu2 %159 }
 0x102   :  { %v162_v35 = vpop.permute.xlu2 %161  ;;  %v156_v36 = vpop.permute.xlu1 %155 }
 0x103   :  { %746 = vmatpush.msk.msra.mxu1 %vm850_vm1, %v162_v35 }
 0x105   :  { %748 = vmatpush.msk.msra.mxu1 %vm850_vm1, %v160_v33 }
 0x10a   :  { %v158_v37 = vpop.permute.xlu0 %157  ;;  %v147_v38 = vpop.permute.xlu2 %146 }
 0x10b   :  { %750 = vmatpush.msk.msra.mxu1 %vm850_vm1, %v158_v37  ;;  %v143_v41 = vpop.permute.xlu1 %142 }
 0x10d   :  { %752 = vmatpush.msk.msra.mxu1 %vm850_vm1, %v156_v36  ;;  %v769_v36 = vld [vmem:[%s1363_s3 + $0x20] sm:$0xff] }
 0x10f   :  { %754 = vmatpush.msk.msra.mxu1 %vm851_vm2, %v147_v38  ;;  %v770_v38 = vld [vmem:[%s1363_s3 + $0x28] sm:$0xff] }
 0x112   :  { %v145_v40 = vpop.permute.xlu0 %144  ;;  %v141_v43 = vpop.permute.xlu2 %140 }
 0x113   :  { %756 = vmatpush.msk.msra.mxu1 %vm851_vm2, %v145_v40  ;;  %v191_v52 = vpop.permute.xlu1 %190  ;;  %v772_v40 = vld [vmem:[%s1363_s3 + $0x38] sm:$0xff] }
 0x115   :  { %758 = vmatpush.msk.msra.mxu1 %vm851_vm2, %v143_v41 }
 0x117   :  { %760 = vmatpush.msk.msra.mxu1 %vm851_vm2, %v141_v43 }
 0x118   :  { %761 = vmatmul.msk.f32.vlgmr.msra.gmra.mxu1 %vm198_vm3, %v170_v42 }
 0x11a   :  { %v186_v53 = vpop.permute.xlu2 %185 }
 0x11b   :  { %v196_v51 = vpop.permute.xlu0 %195  ;;  %v270_v12 = vpop.permute.xlu1 %269 }
 0x120   :  { %762 = vmatmul.msk.f32.gmra.mxu1 %vm198_vm3, %v171_v45 }
 0x122   :  { %v265_v9 = vpop.permute.xlu2 %264 }
 0x123   :  { %v181_v59 = vpop.permute.xlu0 %180 }
 0x128   :  { %763 = vmatmul.msk.f32.gmra.mxu1 %vm198_vm3, %v172_v46 }
 0x12b   :  { %v260_v5 = vpop.permute.xlu0 %259 }
 0x130   :  { %764 = vmatmul.msk.f32.gmra.mxu1 %vm198_vm3, %v173_v47 }
 0x195   :  { %v228_v48 = vpop.f32.mrf.mxu1 }
 0x196   :  { %v229_v60 = vadd.f32 %v228_v48, %v181_v59  ;;  %v799_v59 = vld [vmem:[%s1365_s5 + $0x30] sm:$0xff] }
 0x198   :  { %v240_v63 = vmax.f32 %v229_v60, 0.0  ;;  %v800_v60 = vld [vmem:[%s1365_s5 + $0x38] sm:$0xff] }
 0x19d   :  { %v231_v49 = vpop.f32.mrf.mxu1 }
 0x19e   :  { %v232_v57 = vadd.f32 %v231_v49, %v186_v53 }
 0x1a0   :  { %v241_v62 = vmax.f32 %v232_v57, 0.0  ;;  %v797_v57 = vld [vmem:[%s1365_s5 + $0x20] sm:$0xff] }
 0x1a5   :  { %v234_v50 = vpop.f32.mrf.mxu1 }
 0x1a6   :  { %v235_v55 = vadd.f32 %v234_v50, %v191_v52 }
 0x1a8   :  { %v242_v61 = vmax.f32 %v235_v55, 0.0 }
 0x1ad   :  { %v237_v54 = vpop.f32.mrf.mxu1 }
 0x1ae   :  { %v238_v56 = vadd.f32 %v237_v54, %v196_v51 }
 0x1b0   :  { %v243_v58 = vmax.f32 %v238_v56, 0.0 }
 0x1b2   :  { %296 = vmatpush.msra.mxu2 %v243_v58  ;;  %v798_v58 = vld [vmem:[%s1365_s5 + $0x28] sm:$0xff] }
 0x1b4   :  { %297 = vmatpush.msra.mxu2 %v242_v61 }
 0x1b6   :  { %298 = vmatpush.msra.mxu2 %v241_v62 }
 0x1b8   :  { %299 = vmatpush.msra.mxu2 %v240_v63 }
 0x1b9   :  { %765 = vmatmul.msk.f32.vlgmr.msra.gmra.mxu2 %vm84_vm0, %v244_v0 }
 0x1c1   :  { %766 = vmatmul.msk.f32.gmra.mxu2 %vm84_vm0, %v245_v1 }
 0x1c9   :  { %767 = vmatmul.msk.f32.gmra.mxu2 %vm84_vm0, %v246_v2 }
 0x1d1   :  { %768 = vmatmul.msk.f32.gmra.mxu2 %vm84_vm0, %v247_v3 }
 0x23c   :  { %v301_v4 = vpop.f32.mrf.mxu2 }
 0x244   :  { %v304_v6 = vpop.f32.mrf.mxu2 }
 0x245   :  { %v305_v7 = vadd.f32 %v304_v6, %v260_v5 }
 0x247   :  { %v1139_v8 = vadd.f32 %v305_v7, %v1049_v19  ;;  %v255_v19 = vpop.permute.xlu1 %254 }
 0x248   :  { %v302_v20 = vadd.f32 %v301_v4, %v255_v19  ;;  %v843_v19 = vld [vmem:[%s1366_s6 + $0x50] sm:$0xff] }
 0x249   :  { %334 = vrot.lane.b32.xlu1 %v1139_v8, %s953_s2 }
 0x24a   :  { %v1163_v21 = vadd.f32 %v302_v20, %v1046_v16  ;;  %v802_v16 = vld [vmem:[%s1366_s6 + $0x28] sm:$0xff]  ;;  %v844_v20 = vld [vmem:[%s1366_s6 + $0x58] sm:$0xff] }
 0x24c   :  { %v307_v10 = vpop.f32.mrf.mxu2 }
 0x24d   :  { %v308_v11 = vadd.f32 %v307_v10, %v265_v9  ;;  %v816_v10 = vld [vmem:[%s1364_s4 + $0x58] sm:$0xff] }
 0x24f   :  { %v1144_v13 = vadd.f32 %v308_v11, %v1054_v22  ;;  %v773_v22 = vld [vmem:[%s1364_s4 + $0x20] sm:$0xff] }
 0x251   :  { %336 = vrot.lane.b32.xlu0 %v1144_v13, %s953_s2  ;;  %321 = vrot.lane.b32.xlu1 %v1144_v13, %s954_s28 }
 0x254   :  { %v310_v14 = vpop.f32.mrf.mxu2 }
 0x255   :  { %v311_v15 = vadd.f32 %v310_v14, %v270_v12  ;;  %v813_v14 = vld [vmem:[%s1364_s4 + $0x40] sm:$0xff] }
 0x257   :  { %v1151_v17 = vadd.f32 %v311_v15, %v1062_v25  ;;  %v803_v25 = vld [vmem:[%s1366_s6 + $0x30] sm:$0xff]  ;;  %v842_v15 = vld [vmem:[%s1366_s6 + $0x48] sm:$0xff] }
 0x259   :  { %338 = vrot.lane.b32.xlu2 %v1151_v17, %s953_s2  ;;  %390 = vmatpush.msra.mxu3 %v1151_v17 }
 0x25a   :  { %323 = vrot.lane.b32.xlu0 %v1151_v17, %s954_s28  ;;  %371 = vperm.xlu1 %868, %v776_v18   ;;  %v815_v18 = vld [vmem:[%s1364_s4 + $0x50] sm:$0xff] }
 0x25b   :  { %391 = vmatpush.msra.mxu3 %v1144_v13 }
 0x25d   :  { %392 = vmatpush.msra.mxu3 %v1139_v8 }
 0x25f   :  { %393 = vmatpush.msra.mxu3 %v1163_v21 }
 0x261   :  { %332 = vrot.lane.b32.xlu2 %v1163_v21, %s953_s2 }
 0x262   :  { %356 = vperm.xlu1 %868, %v773_v22   ;;  %317 = vrot.lane.b32.xlu0 %v1163_v21, %s954_s28  ;;  %v841_v22 = vld [vmem:[%s1366_s6 + $0x40] sm:$0xff] }
 0x269   :  { %319 = vrot.lane.b32.xlu2 %v1139_v8, %s954_s28 }
 0x26a   :  { %436 = vperm.xlu1 %868, %v802_v16   ;;  %361 = vperm.xlu0 %867, %v774_v23  }
 0x271   :  { %366 = vperm.xlu2 %869, %v775_v24  }
 0x272   :  { %441 = vperm.xlu0 %867, %v803_v25  }
 0x279   :  { %446 = vperm.xlu2 %869, %v804_v26  }
 0x281   :  { %431 = vperm.xlu2 %869, %v801_v27  }
 0x2b3   :  { %v339_v28 = vpop.permute.xlu2 %338 }
 0x2b4   :  { %778 = vmatpush.msk.msra.mxu3 %vm851_vm2, %v339_v28 }
 0x2bb   :  { %v335_v30 = vpop.permute.xlu1 %334  ;;  %v333_v31 = vpop.permute.xlu2 %332 }
 0x2c3   :  { %v337_v29 = vpop.permute.xlu0 %336  ;;  %v322_v33 = vpop.permute.xlu1 %321 }
 0x2c4   :  { %780 = vmatpush.msk.msra.mxu3 %vm851_vm2, %v337_v29  ;;  %v320_v35 = vpop.permute.xlu2 %319  ;;  %v809_v29 = vld [vmem:[%s1363_s3 + $0x40] sm:$0xff] }
 0x2c6   :  { %782 = vmatpush.msk.msra.mxu3 %vm851_vm2, %v335_v30 }
 0x2c8   :  { %784 = vmatpush.msk.msra.mxu3 %vm851_vm2, %v333_v31  ;;  %v810_v31 = vld [vmem:[%s1363_s3 + $0x48] sm:$0xff] }
 0x2cc   :  { %v324_v32 = vpop.permute.xlu0 %323  ;;  %v372_v44 = vpop.permute.xlu1 %371 }
 0x2cd   :  { %786 = vmatpush.msk.msra.mxu3 %vm852_vm4, %v324_v32  ;;  %v367_v45 = vpop.permute.xlu2 %366  ;;  %v812_v32 = vld [vmem:[%s1363_s3 + $0x58] sm:$0xff] }
 0x2cf   :  { %788 = vmatpush.msk.msra.mxu3 %vm852_vm4, %v322_v33 }
 0x2d1   :  { %790 = vmatpush.msk.msra.mxu3 %vm852_vm4, %v320_v35 }
 0x2d4   :  { %v318_v37 = vpop.permute.xlu0 %317  ;;  %v357_v52 = vpop.permute.xlu1 %356 }
 0x2d5   :  { %792 = vmatpush.msk.msra.mxu3 %vm852_vm4, %v318_v37  ;;  %v447_v5 = vpop.permute.xlu2 %446 }
 0x2d6   :  { %793 = vmatmul.msk.f32.vlgmr.msra.gmra.mxu3 %vm198_vm3, %v769_v36 }
 0x2dc   :  { %v362_v49 = vpop.permute.xlu0 %361  ;;  %v437_v62 = vpop.permute.xlu1 %436 }
 0x2dd   :  { %v432_v11 = vpop.permute.xlu2 %431 }
 0x2de   :  { %794 = vmatmul.msk.f32.gmra.mxu3 %vm198_vm3, %v770_v38 }
 0x2e4   :  { %v442_v2 = vpop.permute.xlu0 %441 }
 0x2e6   :  { %795 = vmatmul.msk.f32.gmra.mxu3 %vm198_vm3, %v771_v39 }
 0x2ee   :  { %796 = vmatmul.msk.f32.gmra.mxu3 %vm198_vm3, %v772_v40 }
 0x359   :  { %v403_v41 = vpop.f32.mrf.mxu3 }
 0x35a   :  { %v404_v53 = vadd.f32 %v403_v41, %v357_v52  ;;  %v838_v52 = vld [vmem:[%s1365_s5 + $0x48] sm:$0xff] }
 0x35c   :  { %v415_v56 = vmax.f32 %v404_v53, 0.0  ;;  %v839_v53 = vld [vmem:[%s1365_s5 + $0x50] sm:$0xff] }
 0x361   :  { %v406_v42 = vpop.f32.mrf.mxu3 }
 0x362   :  { %v407_v50 = vadd.f32 %v406_v42, %v362_v49 }
 0x364   :  { %v416_v55 = vmax.f32 %v407_v50, 0.0  ;;  %v837_v50 = vld [vmem:[%s1365_s5 + $0x40] sm:$0xff] }
 0x369   :  { %v409_v43 = vpop.f32.mrf.mxu3 }
 0x36a   :  { %v410_v47 = vadd.f32 %v409_v43, %v367_v45 }
 0x36c   :  { %v417_v54 = vmax.f32 %v410_v47, 0.0 }
 0x371   :  { %v412_v46 = vpop.f32.mrf.mxu3 }
 0x372   :  { %v413_v48 = vadd.f32 %v412_v46, %v372_v44 }
 0x374   :  { %v418_v51 = vmax.f32 %v413_v48, 0.0 }
 0x376   :  { %473 = vmatpush.msrb.mxu0 %v418_v51  ;;  %v840_v51 = vld [vmem:[%s1365_s5 + $0x58] sm:$0xff] }
 0x378   :  { %474 = vmatpush.msrb.mxu0 %v417_v54 }
 0x37a   :  { %475 = vmatpush.msrb.mxu0 %v416_v55 }
 0x37c   :  { %476 = vmatpush.msrb.mxu0 %v415_v56 }
 0x37d   :  { %805 = vmatmul.msk.f32.vlgmr.msrb.gmra.mxu0 %vm84_vm0, %v797_v57 }
 0x385   :  { %806 = vmatmul.msk.f32.gmra.mxu0 %vm84_vm0, %v798_v58 }
 0x38d   :  { %807 = vmatmul.msk.f32.gmra.mxu0 %vm84_vm0, %v799_v59 }
 0x395   :  { %808 = vmatmul.msk.f32.gmra.mxu0 %vm84_vm0, %v800_v60 }
 0x3fa   :  { %v478_v61 = vpop.f32.mrf.mxu0 }
 0x3fb   :  { %v479_v12 = vadd.f32 %v478_v61, %v432_v11 }
 0x402   :  { %v481_v63 = vpop.f32.mrf.mxu0 }
 0x403   :  { %v482_v0 = vadd.f32 %v481_v63, %v437_v62 }
 0x405   :  { %v1244_v1 = vadd.f32 %v482_v0, %v1139_v8 }
 0x407   :  { %511 = vrot.lane.b32.xlu2 %v1244_v1, %s954_s28 }
 0x40a   :  { %v484_v3 = vpop.f32.mrf.mxu0 }
 0x40b   :  { %v485_v4 = vadd.f32 %v484_v3, %v442_v2 }
 0x40d   :  { %v1249_v6 = vadd.f32 %v485_v4, %v1144_v13  ;;  %v1268_v13 = vadd.f32 %v479_v12, %v1163_v21  ;;  %v676_v21 = vld [vmem:[%s1368_s8] sm:$0xff] }
 0x40f   :  { %513 = vrot.lane.b32.xlu1 %v1249_v6, %s954_s28  ;;  %498 = vrot.lane.b32.xlu2 %v1249_v6, %s950_s19 }
 0x412   :  { %v487_v7 = vpop.f32.mrf.mxu0 }
 0x413   :  { %v488_v9 = vadd.f32 %v487_v7, %v447_v5 }
 0x415   :  { %v1256_v8 = vadd.f32 %v488_v9, %v1151_v17  ;;  %v814_v17 = vld [vmem:[%s1364_s4 + $0x48] sm:$0xff]  ;;  %v675_v9 = vld [vmem:[%s1367_s7] sm:$0xff]  ;;  %s726_s7 = sshll.u32 %s1370_s10, 4  ;;  %s727_s7 = int_to_ptr.hbm [resolvable:$true] %s726_s7 }
 0x417   :  { %515 = vrot.lane.b32.xlu0 %v1256_v8, %s954_s28  ;;  %567 = vmatpush.msrb.mxu2 %v1256_v8 }
 0x418   :  { %500 = vrot.lane.b32.xlu1 %v1256_v8, %s950_s19  ;;  %548 = vperm.xlu2 %869, %v816_v10  }
 0x419   :  { %568 = vmatpush.msrb.mxu2 %v1249_v6 }
 0x41b   :  { %569 = vmatpush.msrb.mxu2 %v1244_v1 }
 0x41d   :  { %570 = vmatpush.msrb.mxu2 %v1268_v13 }
 0x41f   :  { %509 = vrot.lane.b32.xlu0 %v1268_v13, %s954_s28  ;;  %s955_s28 = smov [#allocation5]  }
 0x420   :  { %533 = vperm.xlu2 %869, %v813_v14   ;;  %494 = vrot.lane.b32.xlu1 %v1268_v13, %s950_s19  ;;  %s710_s11 = sshll.u32 %s955_s28, 4  ;;  %s711_s11 = int_to_ptr.vmem [resolvable:$true] %s710_s11 }
 0x427   :  { %496 = vrot.lane.b32.xlu0 %v1244_v1, %s950_s19 }
 0x428   :  { %613 = vperm.xlu2 %869, %v842_v15   ;;  %538 = vperm.xlu1 %868, %v814_v17  }
 0x42f   :  { %543 = vperm.xlu0 %867, %v815_v18  }
 0x430   :  { %618 = vperm.xlu1 %868, %v843_v19  }
 0x437   :  { %623 = vperm.xlu0 %867, %v844_v20  }
 0x438   :  { %679 = vperm.xlu1 %868, %v676_v21  }
 0x43f   :  { %608 = vperm.xlu0 %867, %v841_v22  }
 0x461   :  { %v512_v24 = vpop.permute.xlu2 %511 }
 0x469   :  { %v499_v27 = vpop.permute.xlu2 %498 }
 0x472   :  { %v549_v37 = vpop.permute.xlu2 %548 }
 0x47a   :  { %v534_v45 = vpop.permute.xlu2 %533 }
 0x481   :  { %v514_v16 = vpop.permute.xlu1 %513 }
 0x482   :  { %v614_v61 = vpop.permute.xlu2 %613 }
 0x489   :  { %v516_v23 = vpop.permute.xlu0 %515 }
 0x48a   :  { %818 = vmatpush.msk.msrb.mxu2 %vm852_vm4, %v516_v23  ;;  %v501_v25 = vpop.permute.xlu1 %500 }
 0x48c   :  { %820 = vmatpush.msk.msrb.mxu2 %vm852_vm4, %v514_v16 }
 0x48e   :  { %822 = vmatpush.msk.msrb.mxu2 %vm852_vm4, %v512_v24 }
 0x491   :  { %v510_v26 = vpop.permute.xlu0 %509 }
 0x492   :  { %824 = vmatpush.msk.msrb.mxu2 %vm852_vm4, %v510_v26  ;;  %v495_v30 = vpop.permute.xlu1 %494 }
 0x494   :  { %826 = vmatpush.msk.msrb.mxu2 %vm853_vm5, %v501_v25 }
 0x496   :  { %828 = vmatpush.msk.msrb.mxu2 %vm853_vm5, %v499_v27 }
 0x499   :  { %v497_v28 = vpop.permute.xlu0 %496 }
 0x49a   :  { %830 = vmatpush.msk.msrb.mxu2 %vm853_vm5, %v497_v28  ;;  %v539_v42 = vpop.permute.xlu1 %538 }
 0x49c   :  { %832 = vmatpush.msk.msrb.mxu2 %vm853_vm5, %v495_v30 }
 0x49d   :  { %833 = vmatmul.msk.f32.vlgmr.msrb.gmra.mxu2 %vm198_vm3, %v809_v29 }
 0x4a1   :  { %v544_v38 = vpop.permute.xlu0 %543 }
 0x4a2   :  { %v619_v3 = vpop.permute.xlu1 %618 }
 0x4a5   :  { %834 = vmatmul.msk.f32.gmra.mxu2 %vm198_vm3, %v810_v31 }
 0x4a9   :  { %v624_v54 = vpop.permute.xlu0 %623 }
 0x4ad   :  { %835 = vmatmul.msk.f32.gmra.mxu2 %vm198_vm3, %v811_v34 }
 0x4b1   :  { %v609_v55 = vpop.permute.xlu0 %608 }
 0x4b5   :  { %836 = vmatmul.msk.f32.gmra.mxu2 %vm198_vm3, %v812_v32 }
 0x520   :  { %v580_v33 = vpop.f32.mrf.mxu2 }
 0x521   :  { %v581_v46 = vadd.f32 %v580_v33, %v534_v45 }
 0x523   :  { %v592_v49 = vmax.f32 %v581_v46, 0.0 }
 0x528   :  { %v583_v35 = vpop.f32.mrf.mxu2 }
 0x529   :  { %v584_v43 = vadd.f32 %v583_v35, %v539_v42 }
 0x52b   :  { %v593_v48 = vmax.f32 %v584_v43, 0.0 }
 0x530   :  { %v586_v36 = vpop.f32.mrf.mxu2 }
 0x531   :  { %v587_v40 = vadd.f32 %v586_v36, %v544_v38 }
 0x533   :  { %v594_v47 = vmax.f32 %v587_v40, 0.0 }
 0x538   :  { %v589_v39 = vpop.f32.mrf.mxu2 }
 0x539   :  { %v590_v41 = vadd.f32 %v589_v39, %v549_v37 }
 0x53b   :  { %v595_v44 = vmax.f32 %v590_v41, 0.0 }
 0x53d   :  { %650 = vmatpush.msrb.mxu1 %v595_v44  ;;  %854 = vmatpush.msrb.mxu3 %v595_v44 }
 0x53f   :  { %651 = vmatpush.msrb.mxu1 %v594_v47  ;;  %855 = vmatpush.msrb.mxu3 %v594_v47 }
 0x541   :  { %652 = vmatpush.msrb.mxu1 %v593_v48  ;;  %856 = vmatpush.msrb.mxu3 %v593_v48 }
 0x543   :  { %653 = vmatpush.msrb.mxu1 %v592_v49  ;;  %857 = vmatpush.msrb.mxu3 %v592_v49 }
 0x544   :  { %845 = vmatmul.msk.f32.vlgmr.msrb.gmra.mxu1 %vm84_vm0, %v837_v50  ;;  %848 = vmatmul.msk.f32.vlgmr.msrb.gmra.mxu3 %vm84_vm0, %v840_v51 }
 0x54c   :  { %846 = vmatmul.msk.f32.gmra.mxu1 %vm84_vm0, %v838_v52 }
 0x554   :  { %847 = vmatmul.msk.f32.gmra.mxu1 %vm84_vm0, %v839_v53 }
 0x5c1   :  { %v655_v56 = vpop.f32.mrf.mxu1 }
 0x5c2   :  { %v656_v57 = vadd.f32 %v655_v56, %v609_v55 }
 0x5c4   :  { %v667_v58 = vadd.f32 %v656_v57, %v1268_v13 }
 0x5c6   :  { %671 = vst [vmem:[#allocation5] sm:$0xff] %v667_v58 }
 0x5c7   :  { %v664_v59 = vpop.f32.mrf.mxu3 }
 0x5c8   :  { %v665_v60 = vadd.f32 %v664_v59, %v624_v54 }
 0x5c9   :  { %v658_v62 = vpop.f32.mrf.mxu1 }
 0x5ca   :  { %v670_v63 = vadd.f32 %v665_v60, %v1256_v8  ;;  %v659_v0 = vadd.f32 %v658_v62, %v614_v61 }
 0x5cc   :  { %674 = vst [vmem:[#allocation5 + $0x18] sm:$0xff] %v670_v63  ;;  %v668_v2 = vadd.f32 %v659_v0, %v1244_v1  ;;  %697 = vmatpush.msra.mxu3 %v670_v63  ;;  %v680_v1 = vpop.permute.xlu1 %679 }
 0x5ce   :  { %672 = vst [vmem:[#allocation5 + $0x8] sm:$0xff] %v668_v2 }
 0x5d1   :  { %v661_v4 = vpop.f32.mrf.mxu1 }
 0x5d2   :  { %v662_v5 = vadd.f32 %v661_v4, %v619_v3 }
 0x5d4   :  { %v669_v7 = vadd.f32 %v662_v5, %v1249_v6 }
 0x5d6   :  { %673 = vst [vmem:[#allocation5 + $0x10] sm:$0xff] %v669_v7  ;;  %698 = vmatpush.msra.mxu3 %v669_v7 }
 0x5d7   :  { %718 = dma.vmem_to_hbm [thread:$0]  %s711_s11, 512, %s713_s14, [#allocation4], %s949_s18, %s949_s18, %s950_s19  }
 0x5d8   :  { %699 = vmatpush.msra.mxu3 %v668_v2 }
 0x5da   :  { %700 = vmatpush.msra.mxu3 %v667_v58 }
 0x5db   :  { %849 = vmatmul.msk.f32.vlgmr.msra.gmra.mxu3 %vm84_vm0, %v675_v9 }
 0x65e   :  { %v702_v6 = vpop.f32.mrf.mxu3 }
 0x65f   :  { %v703_v8 = vadd.f32 %v702_v6, %v680_v1 }
 0x661   :  { %705 = vst [vmem:[#allocation6] sm:$0xff] %v703_v8 }
 0x662   :  { %729 = dma.vmem_to_hbm [thread:$0]  %s725_s15, 128, %s727_s7, [#allocation7]  }
 0x663   :  { %944 = dma.done.wait [#allocation4], 512  }
 0x664   :  { %945 = vsyncadd [#allocation4], 4294966784 }
 0x665   :  { %946 = dma.done.wait [#allocation7], 128  }
 0x666   :  { %947 = vsyncadd [#allocation7], 4294967168 }
 0x667   :  { %738 = vsyncpa [#allocation3], 1 }
 0x668   :  { %739 = vsyncpa [#allocation4], 1 }
 0x669   :  { %740 = vsyncpa [#allocation7], 1 }

</bundles_post_ra>
